<compile_context>
chip_gen: v6e
topology: v6e:2x2x1
jax: 0.10.0
libtpu: 0.0.40
codegen_flags: <defaults>
</compile_context>

<pallas_src>
import functools
import math

import jax
import jax.numpy as jnp
from jax.experimental import pallas as pl
from jax.experimental.pallas import tpu as pltpu

_INV_E = float(1.0 / math.e)


def _adj_ce_kernel(logits_ref, labels_ref, out_ref, *, batch):
    """Per-batch-tile body.

    logits_ref : (TB, C)   input dtype, VMEM
    labels_ref : (TB, 1)   int32,       VMEM
    out_ref    : (8, 128)  float32,     VMEM  (tile partial sum, broadcast)
    """
    tb, c = logits_ref.shape
    logits = logits_ref[...].astype(jnp.float32)            # cast after DMA
    labels = labels_ref[...]                                 # (TB, 1) int32

    # Mask rows that fall past the true batch (padded last tile has
    # unspecified logits / labels; they must not reach the partial sum).
    row = jax.lax.broadcasted_iota(jnp.int32, (tb, 1), 0)
    row_valid = (pl.program_id(0) * tb + row) < batch        # (TB, 1) bool
    labels = jnp.where(row_valid, labels, 0)                 # sanitize labels

    col = jax.lax.broadcasted_iota(jnp.int32, (tb, c), 1)    # class indices

    # shifted = logits - rowmax, computed once and reused everywhere below;
    # after this, the f32 logits temp is dead.
    max_val = jnp.max(logits, axis=1, keepdims=True)         # (TB, 1)
    shifted = logits - max_val                                # (TB, C) f32

    # torch.max(outputs, 1): first index of the row maximum.
    # shifted == 0 exactly iff logits == max_val (exact fp subtraction).
    is_max = shifted == 0.0
    argmax = jnp.min(jnp.where(is_max, col, jnp.int32(c)),
                     axis=1, keepdims=True)                   # (TB, 1) int32

    # adj = exp(|argmax - label| / e)  (multiply by precomputed 1/e, EUP exp).
    diff = jnp.abs(argmax - labels).astype(jnp.float32)
    adj = jnp.exp(diff * jnp.float32(_INV_E))                 # (TB, 1)

    # picked log-prob without materializing log_softmax:
    #   picked_logp = shifted[i, label_i] - log(sum_j exp(shifted_ij))
    onehot = col == labels                                    # (TB, C) bool
    picked = jnp.sum(jnp.where(onehot, shifted, 0.0),
                     axis=1, keepdims=True)                   # (TB, 1)
    lse = jnp.log(jnp.sum(jnp.exp(shifted), axis=1, keepdims=True))
    picked_logp = picked - lse                                # (TB, 1)

    # Per-tile partial sum (padded rows masked to 0); write it lane-dense.
    contrib = jnp.where(row_valid, picked_logp * adj, 0.0)
    tile_sum = jnp.sum(contrib, keepdims=True)                # (1, 1)
    out_ref[...] = jnp.broadcast_to(tile_sum, out_ref.shape)


def _choose_batch_tile(batch, num_classes):
    """Batch tile: multiple of 8, ~2 MiB f32-equivalent working set per block,
    and at least 4 grid steps (when the batch allows it) so the "parallel"
    batch axis keeps both v7x TensorCores busy."""
    if batch <= 8:
        return batch                      # single full-batch tile (block = full dim)
    budget_rows = max(8, (2 * 1024 * 1024) // max(1, num_classes * 4))
    tb = min(batch, budget_rows, 1024)
    tb = min(tb, max(8, -(-batch // 4)))  # >= ~4 grid steps when possible
    return max(8, (tb // 8) * 8)


def adj_cross_entropy_loss(outputs, labels):
    """Pallas forward of AdjCrossEntropyLoss.

    outputs: (B, C) float (f32 / bf16 / f16), labels: (B,) int.
    """
    b, c = outputs.shape
    labels2 = labels.astype(jnp.int32).reshape(b, 1)
    itemsize = jnp.dtype(outputs.dtype).itemsize

    tb = _choose_batch_tile(b, c)
    num_tiles = pl.cdiv(b, tb)

    kernel = functools.partial(_adj_ce_kernel, batch=b)

    # Note: if a trace ever shows exposed copy time at these small blocks, add
    # pipeline_mode=pl.Buffered(3) on the logits in_spec (cheap at ~2 MiB).
    per_tile = pl.pallas_call(
        kernel,
        out_shape=jax.ShapeDtypeStruct((num_tiles * 8, 128), jnp.float32),
        grid=(num_tiles,),
        in_specs=[
            pl.BlockSpec((tb, c), lambda i: (i, 0)),
            pl.BlockSpec((tb, 1), lambda i: (i, 0)),
        ],
        out_specs=pl.BlockSpec((8, 128), lambda i: (i, 0)),
        compiler_params=pltpu.CompilerParams(
            dimension_semantics=("parallel",),
            vmem_limit_bytes=40 * 1024 * 1024,
        ),
        cost_estimate=pl.CostEstimate(
            flops=6 * b * c,
            transcendentals=b * c,
            bytes_accessed=b * c * itemsize + b * 4 + num_tiles * 8 * 128 * 4,
        ),
    )(outputs, labels2)

    # One scalar per tile (each (8,128) block holds the same broadcast value);
    # the tiny final reduction over num_tiles values runs in plain JAX.
    partials = per_tile[::8, 0]
    return -jnp.sum(partials) / jnp.float32(b)


def _reference(outputs, labels):
    """Pure-JAX reference mirroring the PyTorch forward exactly (f32 math)."""
    logits = outputs.astype(jnp.float32)
    b = logits.shape[0]
    out_adj = jnp.argmax(logits, axis=1)
    out_adj = jnp.exp(jnp.abs(out_adj - labels).astype(jnp.float32) / math.e)
    logp = jax.nn.log_softmax(logits, axis=1)
    picked = logp[jnp.arange(b), labels]
    return -jnp.sum(picked * out_adj) / b


if __name__ == "__main__":
    key = jax.random.PRNGKey(0)
    k1, k2, k3, k4, k5, k6 = jax.random.split(key, 6)

    # Case 1: f32 logits, batch == tile size (single grid step).
    b1, c1 = 8, 32
    outputs1 = jax.random.normal(k1, (b1, c1), dtype=jnp.float32)
    labels1 = jax.random.randint(k2, (b1,), 0, c1, dtype=jnp.int32)
    loss1 = adj_cross_entropy_loss(outputs1, labels1)
    jax.block_until_ready(loss1)
    ref1 = _reference(outputs1, labels1)
    assert jnp.allclose(loss1, ref1, rtol=1e-4, atol=1e-4), (loss1, ref1)

    # Case 2: bf16 logits + ragged last tile (b=12, tb=8 -> 2 tiles, 4 padded
    # rows masked inside the kernel's partial sum).
    b2, c2 = 12, 40
    outputs2 = jax.random.normal(k3, (b2, c2), dtype=jnp.float32).astype(jnp.bfloat16)
    labels2 = jax.random.randint(k4, (b2,), 0, c2, dtype=jnp.int32)
    loss2 = adj_cross_entropy_loss(outputs2, labels2)
    jax.block_until_ready(loss2)
    ref2 = _reference(outputs2, labels2)   # reference casts bf16->f32, same as kernel
    assert jnp.allclose(loss2, ref2, rtol=2e-3, atol=1e-3), (loss2, ref2)

    # Case 3: f32 logits, multi-tile grid (5 parallel grid steps).
    b3, c3 = 40, 16
    outputs3 = jax.random.normal(k5, (b3, c3), dtype=jnp.float32)
    labels3 = jax.random.randint(k6, (b3,), 0, c3, dtype=jnp.int32)
    loss3 = adj_cross_entropy_loss(outputs3, labels3)
    jax.block_until_ready(loss3)
    ref3 = _reference(outputs3, labels3)
    assert jnp.allclose(loss3, ref3, rtol=1e-4, atol=1e-4), (loss3, ref3)

    print("KERNEL_OK")
</pallas_src>

<mosaic_0001>
module attributes {stable_mosaic.version = 11 : i64} {
  func.func @_adj_ce_kernel(%arg0: i32, %arg1: memref<8x32xf32, #tpu.memory_space<vmem>>, %arg2: memref<8x1xi32, #tpu.memory_space<vmem>>, %arg3: memref<8x128xf32, #tpu.memory_space<vmem>>) attributes {dimension_semantics = [#tpu.dimension_semantics<parallel>], iteration_bounds = array<i64: 1>, scalar_prefetch = 0 : i64, scratch_operands = 0 : i64, tpu.core_type = #tpu.core_type<tc>, window_params = [{transform_indices = @transform_0, window_bounds = array<i64: 8, 32>}, {transform_indices = @transform_1, window_bounds = array<i64: 8, 1>}, {transform_indices = @transform_2, window_bounds = array<i64: 8, 128>}]} {
    %c0 = arith.constant 0 : index
    %c0_0 = arith.constant 0 : index
    %0 = vector.load %arg1[%c0, %c0_0] : memref<8x32xf32, #tpu.memory_space<vmem>>, vector<8x32xf32>
    %c0_1 = arith.constant 0 : index
    %c0_2 = arith.constant 0 : index
    %1 = vector.load %arg2[%c0_1, %c0_2] : memref<8x1xi32, #tpu.memory_space<vmem>>, vector<8x1xi32>
    %2 = tpu.iota {dimensions = array<i32: 0>} : vector<8x1xi32>
    %c8_i32 = arith.constant 8 : i32
    %3 = arith.muli %arg0, %c8_i32 : i32
    %4 = vector.broadcast %3 : i32 to vector<8x1xi32>
    %5 = arith.addi %4, %2 : vector<8x1xi32>
    %c8_i32_3 = arith.constant 8 : i32
    %6 = vector.broadcast %c8_i32_3 : i32 to vector<8x1xi32>
    %7 = arith.cmpi slt, %5, %6 : vector<8x1xi32>
    %c0_i32 = arith.constant 0 : i32
    %8 = vector.broadcast %c0_i32 : i32 to vector<8x1xi32>
    %9 = arith.select %7, %1, %8 : vector<8x1xi1>, vector<8x1xi32>
    %10 = tpu.iota {dimensions = array<i32: 1>} : vector<8x32xi32>
    %cst = arith.constant dense<0xFF800000> : vector<8xf32>
    %11 = vector.multi_reduction <maximumf>, %0, %cst [1] : vector<8x32xf32> to vector<8xf32>
    %12 = vector.shape_cast %11 : vector<8xf32> to vector<8x1xf32>
    %13 = vector.broadcast %12 : vector<8x1xf32> to vector<8x32xf32>
    %14 = arith.subf %0, %13 : vector<8x32xf32>
    %cst_4 = arith.constant 0.000000e+00 : f32
    %15 = vector.broadcast %cst_4 : f32 to vector<8x32xf32>
    %16 = arith.cmpf oeq, %14, %15 : vector<8x32xf32>
    %c32_i32 = arith.constant 32 : i32
    %17 = vector.broadcast %c32_i32 : i32 to vector<8x32xi32>
    %18 = arith.select %16, %10, %17 : vector<8x32xi1>, vector<8x32xi32>
    %cst_5 = arith.constant dense<2147483647> : vector<8xi32>
    %19 = vector.multi_reduction <minsi>, %18, %cst_5 [1] : vector<8x32xi32> to vector<8xi32>
    %20 = vector.shape_cast %19 : vector<8xi32> to vector<8x1xi32>
    %21 = arith.subi %20, %9 : vector<8x1xi32>
    %22 = math.absi %21 : vector<8x1xi32>
    %23 = arith.sitofp %22 : vector<8x1xi32> to vector<8x1xf32>
    %cst_6 = arith.constant 0.36787945 : f32
    %24 = vector.broadcast %cst_6 : f32 to vector<8x1xf32>
    %25 = arith.mulf %23, %24 : vector<8x1xf32>
    %26 = math.exp %25 : vector<8x1xf32>
    %27 = vector.broadcast %9 : vector<8x1xi32> to vector<8x32xi32>
    %28 = arith.cmpi eq, %10, %27 : vector<8x32xi32>
    %cst_7 = arith.constant 0.000000e+00 : f32
    %29 = vector.broadcast %cst_7 : f32 to vector<8x32xf32>
    %30 = arith.select %28, %14, %29 : vector<8x32xi1>, vector<8x32xf32>
    %cst_8 = arith.constant dense<0.000000e+00> : vector<8xf32>
    %31 = vector.multi_reduction <add>, %30, %cst_8 [1] : vector<8x32xf32> to vector<8xf32>
    %32 = vector.shape_cast %31 : vector<8xf32> to vector<8x1xf32>
    %33 = math.exp %14 : vector<8x32xf32>
    %cst_9 = arith.constant dense<0.000000e+00> : vector<8xf32>
    %34 = vector.multi_reduction <add>, %33, %cst_9 [1] : vector<8x32xf32> to vector<8xf32>
    %35 = vector.shape_cast %34 : vector<8xf32> to vector<8x1xf32>
    %36 = math.log %35 : vector<8x1xf32>
    %37 = arith.subf %32, %36 : vector<8x1xf32>
    %38 = arith.mulf %37, %26 : vector<8x1xf32>
    %cst_10 = arith.constant 0.000000e+00 : f32
    %39 = vector.broadcast %cst_10 : f32 to vector<8x1xf32>
    %40 = arith.select %7, %38, %39 : vector<8x1xi1>, vector<8x1xf32>
    %41 = vector.shape_cast %40 : vector<8x1xf32> to vector<1x8x1xf32>
    %cst_11 = arith.constant dense<0.000000e+00> : vector<1xf32>
    %42 = vector.multi_reduction <add>, %41, %cst_11 [1, 2] : vector<1x8x1xf32> to vector<1xf32>
    %43 = vector.shape_cast %42 : vector<1xf32> to vector<1x1x1xf32>
    %44 = vector.extract %43[0, 0, 0] : f32 from vector<1x1x1xf32>
    %45 = vector.broadcast %44 : f32 to vector<1x1xf32>
    %46 = vector.shape_cast %45 : vector<1x1xf32> to vector<1x1xf32>
    %47 = vector.broadcast %46 : vector<1x1xf32> to vector<8x128xf32>
    %c0_12 = arith.constant 0 : index
    %c0_13 = arith.constant 0 : index
    %48 = vector.load %arg3[%c0_12, %c0_13] : memref<8x128xf32, #tpu.memory_space<vmem>>, vector<8x128xf32>
    tpu.vector_store %arg3[%c0_12, %c0_13], %47 {strides = array<i32>} : memref<8x128xf32, #tpu.memory_space<vmem>>, vector<8x128xf32>,
    return
  }
  func.func @transform_0(%arg0: i32) -> (i32, i32) {
    %c0_i32 = arith.constant 0 : i32
    %c0_i32_0 = arith.constant 0 : i32
    return %arg0, %c0_i32 : i32, i32
  }
  func.func @transform_1(%arg0: i32) -> (i32, i32) {
    %c0_i32 = arith.constant 0 : i32
    %c0_i32_0 = arith.constant 0 : i32
    return %arg0, %c0_i32 : i32, i32
  }
  func.func @transform_2(%arg0: i32) -> (i32, i32) {
    %c0_i32 = arith.constant 0 : i32
    %c0_i32_0 = arith.constant 0 : i32
    return %arg0, %c0_i32 : i32, i32
  }
}

</mosaic_0001>

<bundles_post_ra>
// kernel: tpu_custom_call.1
= control target key start
LH: loop header
LB: loop body
LE: loop exit
PB: predicated region body
PF: predicated region fallthrough
CT: control target
= control target key end

     0   :  { %vm23_vm0 = vcmask 261120   ;;  %s163_s0 = inlined_call_operand.vmem [shape: f32[8,32], index: 0, kind: input, shape index: {}]   ;;  %s164_s1 = inlined_call_operand.vmem [shape: s32[8,1], index: 1, kind: input, shape index: {}]   ;;  %s165_s2 = inlined_call_operand.hbm [shape: f32[8,128], index: 2, kind: output, shape index: {}]  }
   0x1   :  { %v12_v0 = vld [vmem:[%s163_s0] sm:$0xff] }
   0x2   :  { %v13_v1 = vld [vmem:[%s164_s1] sm:$0xff] }
   0x3   :  { %7 = vsyncpa [#allocation3], 0  ;;  %v24_v2 = vsel %vm23_vm0, %v12_v0, -inf  ;;  %v133_v3 = vmov 0   ;;  %v21_v4 = vlaneseq  ;;  %vm71_vm4 = vcmask 7168   ;;  %s134_s0 = smov [#allocation2]  }
   0x4   :  { %103 = vset.pattern.permute.xlu1 %v133_v3  ;;  %104 = vset.pattern.permute.xlu0 %v133_v3  ;;  %s90_s1 = sshll.u32 %s134_s0, 4  ;;  %s91_s1 = int_to_ptr.vmem [resolvable:$true] %s90_s1 }
   0x5   :  { %25 = vmax.xlane.f32.xlu0 %v24_v2  ;;  %54 = vperm.xlu1 %103, %v13_v1   ;;  %v22_v7 = vand.u32 127, %v21_v4  ;;  %s111_s14 = scalar_lea.vmem %s91_s1, 128  ;;  %p116_p1 = scmp.lt.s32.totalorder %s91_s1, %s91_s1 }
   0x6   :  { %p112_p0 = scmp.ne.s32.totalorder %s91_s1, %s111_s14  ;;  %p117_p2 = scmp.lt.s32.totalorder %s111_s14, %s111_s14 }
   0x8   :  { %p118_p3 = por %p117_p2, %p116_p1 }
   0xa   :  { %p119_p4 = pnand %p118_p3, %p112_p0 }
  0x80   :  { %v55_v13 = vpop.permute.xlu1 %54 }
  0x81   :  { %vm56_vm2 = vcmp.eq.s32.totalorder %v22_v7, %v55_v13 }
  0x8e   :  { %v26_v5 = vpop.xlane.xlu0 %25 }
  0x8f   :  { %v27_v6 = vsub.f32 %v12_v0, %v26_v5 }
  0x91   :  { %v61_v8 = vmul.f32 1.442695, %v27_v6  ;;  %vm28_vm1 = vcmp.eq.f32.partialorder %v27_v6, 0.0  ;;  %v57_v16 = vsel %vm56_vm2, %v27_v6, 0.0 }
  0x92   :  { %v29_v9 = vsel %vm28_vm1, %v22_v7, 32  ;;  %v58_v17 = vsel %vm23_vm0, %v57_v16, 0.0 }
  0x93   :  { %105 = vpow2.f32 %v61_v8  ;;  %v30_v10 = vsel %vm23_vm0, %v29_v9, 2147483647 }
  0x94   :  { %v32_v11 = vshra.s32 %v30_v10, 16  ;;  %v31_v18 = vand.u32 65535, %v30_v10 }
  0x96   :  { %v34_v12 = vcvt.s32.f32 %v32_v11  ;;  %v33_v20 = vcvt.s32.f32 %v31_v18 }
  0x98   :  { %35 = vmin.xlane.f32.xlu0 %v34_v12 }
  0xa0   :  { %v106_v14 = vpop.eup %105 }
  0xa1   :  { %v63_v15 = vsel %vm23_vm0, %v106_v14, 0.0 }
  0xa2   :  { %64 = vadd.xlane.f32.xlu0 %v63_v15 }
  0xa6   :  { %59 = vadd.xlane.f32.xlu0 %v58_v17 }
 0x121   :  { %v36_v19 = vpop.xlane.xlu0 %35 }
 0x122   :  { %vm37_vm3 = vcmp.eq.f32.partialorder %v34_v12, %v36_v19  ;;  %v42_v22 = vcvt.f32.s32 %v36_v19 }
 0x123   :  { %v38_v21 = vsel %vm37_vm3, %v33_v20, inf }
 0x124   :  { %39 = vmin.xlane.f32.xlu1 %v38_v21  ;;  %v43_v24 = vshll.u32 %v42_v22, 16 }
 0x12b   :  { %v65_v28 = vpop.xlane.xlu0 %64 }
 0x12c   :  { %107 = vlog2.f32 %v65_v28 }
 0x12f   :  { %v60_v36 = vpop.xlane.xlu0 %59 }
 0x139   :  { %v108_v34 = vpop.eup %107 }
 0x13a   :  { %v67_v35 = vmul.f32 0.6931472, %v108_v34 }
 0x13c   :  { %v68_v37 = vsub.f32 %v60_v36, %v67_v35 }
 0x1ad   :  { %v40_v23 = vpop.xlane.xlu1 %39 }
 0x1ae   :  { %v41_v25 = vcvt.f32.s32 %v40_v23 }
 0x1b0   :  { %v44_v26 = vadd.s32 %v43_v24, %v41_v25 }
 0x1b2   :  { %v45_v27 = vsub.s32 %v44_v26, %v13_v1 }
 0x1b4   :  { %v47_v29 = vsub.s32 0, %v45_v27 }
 0x1b6   :  { %v98_v30 = vmin.u32 %v47_v29, %v45_v27 }
 0x1b8   :  { %v49_v31 = vcvt.s32.f32 %v98_v30 }
 0x1ba   :  { %v50_v32 = vmul.f32 0.36787945, %v49_v31 }
 0x1bc   :  { %v51_v33 = vmul.f32 1.442695, %v50_v32 }
 0x1be   :  { %109 = vpow2.f32 %v51_v33 }
 0x1cb   :  { %v110_v38 = vpop.eup %109 }
 0x1cc   :  { %v69_v39 = vmul.f32 %v110_v38, %v68_v37 }
 0x1ce   :  { %v72_v40 = vsel %vm71_vm4, %v69_v39, 0.0 }
 0x1cf   :  { %73 = vadd.xlane.f32.xlu0 %v72_v40 }
 0x258   :  { %v74_v41 = vpop.xlane.xlu0 %73 }
 0x259   :  { %v75_v42 = vrot.slane %v74_v41, 4 }
 0x25b   :  { %v76_v43 = vadd.f32 %v75_v42, %v74_v41 }
 0x25d   :  { %v77_v44 = vrot.slane %v76_v43, 2 }
 0x25f   :  { %v78_v45 = vadd.f32 %v77_v44, %v76_v43 }
 0x261   :  { %v79_v46 = vrot.slane %v78_v45, 1 }
 0x263   :  { %v80_v47 = vadd.f32 %v79_v46, %v78_v45 }
 0x265   :  { %99 = vpush %v80_v47 }
 0x296   :  { %s100_s13 = spop %99 }
 0x297   :  { %v82_v48 = vstv %s100_s13 }
 0x298   :  { %83 = vst [vmem:[#allocation2] sm:$0xff] %v82_v48 }
 0x299   :  { %122 = shalt.err (!%p119_p4)
}
 0x29a   :  { %93 = dma.vmem_to_hbm [thread:$0]  %s91_s1, 128, %s165_s2, [#allocation3]  }
 0x29b   :  { %131 = dma.done.wait [#allocation3], 128  }
 0x29c   :  { %132 = vsyncadd [#allocation3], 4294967168 }
 0x29d   :  { %97 = vsyncpa [#allocation3], 1 }

</bundles_post_ra>
